<compile_context>
chip_gen: v5e
topology: v5e:2x2
jax: 0.10.0
libtpu: 0.0.40
codegen_flags: <defaults>
</compile_context>

<pallas_src>
import math

import jax
import jax.numpy as jnp
from jax import lax
from jax.experimental import pallas as pl
from jax.experimental.pallas import tpu as pltpu


def _round_up(x, m):
    return ((x + m - 1) // m) * m


def _tnsm_kernel(temperature, q, k, c_tile, n_classes, n_classes_padded):
    """Builds the kernel body with the module hyper-parameters baked in."""
    inv_temp = 1.0 / temperature
    inv_q = 1.0 / q
    lqk = (1.0 - k ** q) / q  # scalar constant, same for every sample

    def kernel(emb_ref, cls_ref, tgt_ref, w_ref, out_ref, m_sc, l_sc, t_sc):
        c = pl.program_id(1)

        @pl.when(c == 0)
        def _():
            m_sc[...] = jnp.full_like(m_sc, -jnp.inf)
            l_sc[...] = jnp.zeros_like(l_sc)
            t_sc[...] = jnp.zeros_like(t_sc)

        # logits tile (b_tile, c_tile): contract the last dim of BOTH operands
        # (trans_b form) so no in-kernel transpose feeds the MXU.
        s = lax.dot_general(
            emb_ref[...], cls_ref[...],
            dimension_numbers=(((1,), (1,)), ((), ())),
            preferred_element_type=jnp.float32) * inv_temp

        col = lax.broadcasted_iota(jnp.int32, s.shape, 1)  # local class index
        if n_classes_padded != n_classes:
            # Mask padded classes out of the softmax (only the last class tile
            # actually contains any).  Trace-time no-op when C % c_tile == 0.
            s = jnp.where(col < n_classes - c * c_tile, s, -1e30)

        # Online softmax update (never materializes the probability matrix).
        m_prev = m_sc[...]
        m_new = jnp.maximum(m_prev, jnp.max(s, axis=1, keepdims=True))
        alpha = jnp.exp(m_prev - m_new)
        e = jnp.exp(s - m_new)

        tgt_local = tgt_ref[...] - c * c_tile               # (b_tile, 1)
        l_sc[...] = alpha * l_sc[...] + jnp.sum(e, axis=1, keepdims=True)
        t_sc[...] = alpha * t_sc[...] + jnp.sum(
            jnp.where(col == tgt_local, e, 0.0), axis=1, keepdims=True)
        m_sc[...] = m_new

        @pl.when(c == pl.num_programs(1) - 1)
        def _():
            # Yg = softmax(logits)[i, target_i]; GCE-style truncated loss.
            yg = t_sc[...] * pl.reciprocal(l_sc[...], approx=True)
            out_ref[...] = ((1.0 - jnp.power(yg, q)) * inv_q - lqk) * w_ref[...]

    return kernel


def truncated_nsm_forward(embeddings, targets, indexes, cls_weights,
                          sample_weight, *, temperature=0.05, q=0.7, k=0.5,
                          b_tile=128, c_tile=512,
                          compute_dtype=jnp.bfloat16):
    """Pallas implementation of TruncatedNSM.forward. Returns a scalar loss."""
    B, D = embeddings.shape
    C, _ = cls_weights.shape

    b_tile = _round_up(min(b_tile, B), 8)        # sublane-aligned batch tile
    c_tile = _round_up(min(c_tile, C), 128)      # lane-dense class tile
    d_pad = _round_up(D, 128)                    # lane-dense contraction dim
    b_pad = _round_up(B, b_tile)
    c_pad = _round_up(C, c_tile)

    # ---- glue done once in JAX (hoisted out of the per-tile inner loop) ----
    # L2-normalize class weights (mirrors torch F.normalize: x / max(||x||,
    # 1e-12)) exactly once, then stream them to the kernel in bf16.
    w32 = cls_weights.astype(jnp.float32)
    norm_w = w32 / jnp.maximum(
        jnp.sqrt(jnp.sum(w32 * w32, axis=1, keepdims=True)), 1e-12)

    emb_p = jnp.pad(embeddings.astype(jnp.float32),
                    ((0, b_pad - B), (0, d_pad - D))).astype(compute_dtype)
    cls_p = jnp.pad(norm_w,
                    ((0, c_pad - C), (0, d_pad - D))).astype(compute_dtype)
    tgt_p = jnp.pad(targets.astype(jnp.int32).reshape(B, 1),
                    ((0, b_pad - B), (0, 0)))
    w_sel = sample_weight[indexes].reshape(B, 1).astype(jnp.float32)
    w_p = jnp.pad(w_sel, ((0, b_pad - B), (0, 0)))  # padded rows -> weight 0

    grid = (b_pad // b_tile, c_pad // c_tile)

    # VMEM budget: double-buffered input/output tiles + scratch + in-kernel
    # (b_tile, c_tile) intermediates, with 2x headroom; capped well below the
    # 64 MiB/TC available on v7x.
    itemsize = jnp.dtype(compute_dtype).itemsize
    est = (2 * b_tile * d_pad * itemsize          # embedding tiles (x2 bufs)
           + 2 * c_tile * d_pad * itemsize        # class-weight tiles (x2 bufs)
           + 6 * b_tile * 128 * 4                 # tgt / w_sel / out tiles
           + 3 * b_tile * 128 * 4                 # m / l / t scratch
           + 6 * b_tile * c_tile * 4)             # logits/exp intermediates
    vmem_limit = int(min(48 * 1024 * 1024, max(2 * est, 16 * 1024 * 1024)))

    per_sample = pl.pallas_call(
        _tnsm_kernel(temperature, q, k, c_tile, C, c_pad),
        out_shape=jax.ShapeDtypeStruct((b_pad, 1), jnp.float32),
        grid_spec=pltpu.PrefetchScalarGridSpec(
            num_scalar_prefetch=0,
            grid=grid,
            in_specs=[
                pl.BlockSpec((b_tile, d_pad), lambda b, c: (b, 0)),  # embeddings
                pl.BlockSpec((c_tile, d_pad), lambda b, c: (c, 0)),  # norm weights
                pl.BlockSpec((b_tile, 1), lambda b, c: (b, 0)),      # targets
                pl.BlockSpec((b_tile, 1), lambda b, c: (b, 0)),      # weight[indexes]
            ],
            out_specs=pl.BlockSpec((b_tile, 1), lambda b, c: (b, 0)),
            scratch_shapes=[pltpu.VMEM((b_tile, 1), jnp.float32)] * 3,
        ),
        compiler_params=pltpu.CompilerParams(
            dimension_semantics=("parallel", "arbitrary"),
            vmem_limit_bytes=vmem_limit),
    )(emb_p, cls_p, tgt_p, w_p)

    # Padded rows contribute exactly 0 (zero sample weight); single final scale.
    return jnp.sum(per_sample) / B


def reference_forward(embeddings, targets, indexes, cls_weights, sample_weight,
                      *, temperature=0.05, q=0.7, k=0.5,
                      compute_dtype=jnp.bfloat16):
    """Plain-JAX reference mirroring the PyTorch forward (same bf16 matmul)."""
    w32 = cls_weights.astype(jnp.float32)
    norm_w = w32 / jnp.maximum(jnp.linalg.norm(w32, axis=1, keepdims=True), 1e-12)
    logits = jnp.dot(embeddings.astype(compute_dtype),
                     norm_w.astype(compute_dtype).T,
                     preferred_element_type=jnp.float32) / temperature
    p = jax.nn.softmax(logits, axis=1)
    yg = jnp.take_along_axis(p, targets[:, None], axis=1)
    w_sel = sample_weight[indexes]
    loss = (1.0 - yg ** q) / q * w_sel - (1.0 - k ** q) / q * w_sel
    return jnp.mean(loss)


if __name__ == "__main__":
    # Small shapes chosen so the grid is actually exercised:
    #   batch=48 with b_tile=16  -> 3 parallel batch tiles
    #   nb_class=200, c_tile=128 -> C padded to 256 -> 2 class tiles (online softmax)
    dim = 32
    nb_class = 200
    nb_train_samples = 512
    batch = 48

    key = jax.random.PRNGKey(0)
    k_emb, k_cls, k_tgt, k_idx = jax.random.split(key, 4)

    # Deterministic parameter init (matches __init__ shapes):
    # cls_weights ~ U(-stdv, stdv), stdv = 1/sqrt(dim); weight = ones(N, 1).
    stdv = 1.0 / math.sqrt(dim)
    cls_weights = jax.random.uniform(
        k_cls, (nb_class, dim), minval=-stdv, maxval=stdv, dtype=jnp.float32)
    sample_weight = jnp.ones((nb_train_samples, 1), dtype=jnp.float32)

    embeddings = jax.random.normal(k_emb, (batch, dim), dtype=jnp.float32)
    targets = jax.random.randint(k_tgt, (batch,), 0, nb_class, dtype=jnp.int32)
    indexes = jax.random.randint(k_idx, (batch,), 0, nb_train_samples,
                                 dtype=jnp.int32)

    loss = truncated_nsm_forward(
        embeddings, targets, indexes, cls_weights, sample_weight,
        temperature=0.05, q=0.7, k=0.5, b_tile=16, c_tile=128)
    loss = jax.block_until_ready(loss)

    ref = reference_forward(
        embeddings, targets, indexes, cls_weights, sample_weight,
        temperature=0.05, q=0.7, k=0.5)
    assert jnp.allclose(loss, ref, atol=2e-3, rtol=2e-3), (loss, ref)

    print("KERNEL_OK")
</pallas_src>

<mosaic_0001>
module attributes {stable_mosaic.version = 11 : i64} {
  func.func @kernel(%arg0: i32, %arg1: i32, %arg2: memref<16x128xbf16, #tpu.memory_space<vmem>>, %arg3: memref<128x128xbf16, #tpu.memory_space<vmem>>, %arg4: memref<16x1xi32, #tpu.memory_space<vmem>>, %arg5: memref<16x1xf32, #tpu.memory_space<vmem>>, %arg6: memref<16x1xf32, #tpu.memory_space<vmem>>, %arg7: memref<16x1xf32, #tpu.memory_space<vmem>>, %arg8: memref<16x1xf32, #tpu.memory_space<vmem>>, %arg9: memref<16x1xf32, #tpu.memory_space<vmem>>) attributes {dimension_semantics = [#tpu.dimension_semantics<parallel>, #tpu.dimension_semantics<arbitrary>], iteration_bounds = array<i64: 3, 2>, scalar_prefetch = 0 : i64, scratch_operands = 3 : i64, tpu.core_type = #tpu.core_type<tc>, window_params = [{transform_indices = @transform_0, window_bounds = array<i64: 16, 128>}, {transform_indices = @transform_1, window_bounds = array<i64: 128, 128>}, {transform_indices = @transform_2, window_bounds = array<i64: 16, 1>}, {transform_indices = @transform_3, window_bounds = array<i64: 16, 1>}, {transform_indices = @transform_4, window_bounds = array<i64: 16, 1>}]} {
    %c0_i32 = arith.constant 0 : i32
    %0 = arith.cmpi eq, %arg1, %c0_i32 : i32
    %1 = arith.extui %0 : i1 to i32
    %c0_i32_0 = arith.constant 0 : i32
    %2 = arith.cmpi ne, %1, %c0_i32_0 : i32
    scf.if %2 {
      %cst_26 = arith.constant 0xFF800000 : f32
      %48 = vector.broadcast %cst_26 : f32 to vector<16x1xf32>
      %c0_27 = arith.constant 0 : index
      %c0_28 = arith.constant 0 : index
      %49 = vector.load %arg7[%c0_27, %c0_28] : memref<16x1xf32, #tpu.memory_space<vmem>>, vector<16x1xf32>
      tpu.vector_store %arg7[%c0_27, %c0_28], %48 {strides = array<i32>} : memref<16x1xf32, #tpu.memory_space<vmem>>, vector<16x1xf32>,
      %cst_29 = arith.constant 0.000000e+00 : f32
      %50 = vector.broadcast %cst_29 : f32 to vector<16x1xf32>
      %c0_30 = arith.constant 0 : index
      %c0_31 = arith.constant 0 : index
      %51 = vector.load %arg8[%c0_30, %c0_31] : memref<16x1xf32, #tpu.memory_space<vmem>>, vector<16x1xf32>
      tpu.vector_store %arg8[%c0_30, %c0_31], %50 {strides = array<i32>} : memref<16x1xf32, #tpu.memory_space<vmem>>, vector<16x1xf32>,
      %cst_32 = arith.constant 0.000000e+00 : f32
      %52 = vector.broadcast %cst_32 : f32 to vector<16x1xf32>
      %c0_33 = arith.constant 0 : index
      %c0_34 = arith.constant 0 : index
      %53 = vector.load %arg9[%c0_33, %c0_34] : memref<16x1xf32, #tpu.memory_space<vmem>>, vector<16x1xf32>
      tpu.vector_store %arg9[%c0_33, %c0_34], %52 {strides = array<i32>} : memref<16x1xf32, #tpu.memory_space<vmem>>, vector<16x1xf32>,
    } else {
    }
    %c0 = arith.constant 0 : index
    %c0_1 = arith.constant 0 : index
    %3 = vector.load %arg2[%c0, %c0_1] : memref<16x128xbf16, #tpu.memory_space<vmem>>, vector<16x128xbf16>
    %c0_2 = arith.constant 0 : index
    %c0_3 = arith.constant 0 : index
    %4 = vector.load %arg3[%c0_2, %c0_3] : memref<128x128xbf16, #tpu.memory_space<vmem>>, vector<128x128xbf16>
    %cst = arith.constant dense<0.000000e+00> : vector<16x128xf32>
    %5 = tpu.matmul %3, %4, %cst {dimension_numbers = #tpu.dot_dimension_numbers<[1], [1], [0], [0], [0, 0, 1, 0], [], []>} : vector<16x128xbf16>, vector<128x128xbf16>, vector<16x128xf32> -> vector<16x128xf32>
    %cst_4 = arith.constant 2.000000e+01 : f32
    %6 = vector.broadcast %cst_4 : f32 to vector<16x128xf32>
    %7 = arith.mulf %5, %6 : vector<16x128xf32>
    %8 = tpu.iota {dimensions = array<i32: 1>} : vector<16x128xi32>
    %c128_i32 = arith.constant 128 : i32
    %9 = arith.muli %arg1, %c128_i32 : i32
    %c200_i32 = arith.constant 200 : i32
    %10 = arith.subi %c200_i32, %9 : i32
    %11 = vector.broadcast %10 : i32 to vector<16x128xi32>
    %12 = arith.cmpi slt, %8, %11 : vector<16x128xi32>
    %cst_5 = arith.constant -1.000000e+30 : f32
    %13 = vector.broadcast %cst_5 : f32 to vector<16x128xf32>
    %14 = arith.select %12, %7, %13 : vector<16x128xi1>, vector<16x128xf32>
    %c0_6 = arith.constant 0 : index
    %c0_7 = arith.constant 0 : index
    %15 = vector.load %arg7[%c0_6, %c0_7] : memref<16x1xf32, #tpu.memory_space<vmem>>, vector<16x1xf32>
    %cst_8 = arith.constant dense<0xFF800000> : vector<16xf32>
    %16 = vector.multi_reduction <maximumf>, %14, %cst_8 [1] : vector<16x128xf32> to vector<16xf32>
    %17 = vector.shape_cast %16 : vector<16xf32> to vector<16x1xf32>
    %18 = arith.maximumf %15, %17 : vector<16x1xf32>
    %19 = arith.subf %15, %18 : vector<16x1xf32>
    %20 = math.exp %19 : vector<16x1xf32>
    %21 = vector.broadcast %18 : vector<16x1xf32> to vector<16x128xf32>
    %22 = arith.subf %14, %21 : vector<16x128xf32>
    %23 = math.exp %22 : vector<16x128xf32>
    %c0_9 = arith.constant 0 : index
    %c0_10 = arith.constant 0 : index
    %24 = vector.load %arg4[%c0_9, %c0_10] : memref<16x1xi32, #tpu.memory_space<vmem>>, vector<16x1xi32>
    %c128_i32_11 = arith.constant 128 : i32
    %25 = arith.muli %arg1, %c128_i32_11 : i32
    %26 = vector.broadcast %25 : i32 to vector<16x1xi32>
    %27 = arith.subi %24, %26 : vector<16x1xi32>
    %c0_12 = arith.constant 0 : index
    %c0_13 = arith.constant 0 : index
    %28 = vector.load %arg8[%c0_12, %c0_13] : memref<16x1xf32, #tpu.memory_space<vmem>>, vector<16x1xf32>
    %29 = arith.mulf %20, %28 : vector<16x1xf32>
    %cst_14 = arith.constant dense<0.000000e+00> : vector<16xf32>
    %30 = vector.multi_reduction <add>, %23, %cst_14 [1] : vector<16x128xf32> to vector<16xf32>
    %31 = vector.shape_cast %30 : vector<16xf32> to vector<16x1xf32>
    %32 = arith.addf %29, %31 : vector<16x1xf32>
    %c0_15 = arith.constant 0 : index
    %c0_16 = arith.constant 0 : index
    %33 = vector.load %arg8[%c0_15, %c0_16] : memref<16x1xf32, #tpu.memory_space<vmem>>, vector<16x1xf32>
    tpu.vector_store %arg8[%c0_15, %c0_16], %32 {strides = array<i32>} : memref<16x1xf32, #tpu.memory_space<vmem>>, vector<16x1xf32>,
    %c0_17 = arith.constant 0 : index
    %c0_18 = arith.constant 0 : index
    %34 = vector.load %arg9[%c0_17, %c0_18] : memref<16x1xf32, #tpu.memory_space<vmem>>, vector<16x1xf32>
    %35 = arith.mulf %20, %34 : vector<16x1xf32>
    %36 = vector.broadcast %27 : vector<16x1xi32> to vector<16x128xi32>
    %37 = arith.cmpi eq, %8, %36 : vector<16x128xi32>
    %cst_19 = arith.constant 0.000000e+00 : f32
    %38 = vector.broadcast %cst_19 : f32 to vector<16x128xf32>
    %39 = arith.select %37, %23, %38 : vector<16x128xi1>, vector<16x128xf32>
    %cst_20 = arith.constant dense<0.000000e+00> : vector<16xf32>
    %40 = vector.multi_reduction <add>, %39, %cst_20 [1] : vector<16x128xf32> to vector<16xf32>
    %41 = vector.shape_cast %40 : vector<16xf32> to vector<16x1xf32>
    %42 = arith.addf %35, %41 : vector<16x1xf32>
    %c0_21 = arith.constant 0 : index
    %c0_22 = arith.constant 0 : index
    %43 = vector.load %arg9[%c0_21, %c0_22] : memref<16x1xf32, #tpu.memory_space<vmem>>, vector<16x1xf32>
    tpu.vector_store %arg9[%c0_21, %c0_22], %42 {strides = array<i32>} : memref<16x1xf32, #tpu.memory_space<vmem>>, vector<16x1xf32>,
    %c0_23 = arith.constant 0 : index
    %c0_24 = arith.constant 0 : index
    %44 = vector.load %arg7[%c0_23, %c0_24] : memref<16x1xf32, #tpu.memory_space<vmem>>, vector<16x1xf32>
    tpu.vector_store %arg7[%c0_23, %c0_24], %18 {strides = array<i32>} : memref<16x1xf32, #tpu.memory_space<vmem>>, vector<16x1xf32>,
    %c1_i32 = arith.constant 1 : i32
    %45 = arith.cmpi eq, %arg1, %c1_i32 : i32
    %46 = arith.extui %45 : i1 to i32
    %c0_i32_25 = arith.constant 0 : i32
    %47 = arith.cmpi ne, %46, %c0_i32_25 : i32
    scf.if %47 {
      %c0_26 = arith.constant 0 : index
      %c0_27 = arith.constant 0 : index
      %48 = vector.load %arg9[%c0_26, %c0_27] : memref<16x1xf32, #tpu.memory_space<vmem>>, vector<16x1xf32>
      %c0_28 = arith.constant 0 : index
      %c0_29 = arith.constant 0 : index
      %49 = vector.load %arg8[%c0_28, %c0_29] : memref<16x1xf32, #tpu.memory_space<vmem>>, vector<16x1xf32>
      %50 = tpu.reciprocal %49 {approx = true} : vector<16x1xf32> -> vector<16x1xf32>
      %51 = arith.mulf %48, %50 : vector<16x1xf32>
      %cst_30 = arith.constant 0.699999988 : f32
      %52 = vector.broadcast %cst_30 : f32 to vector<16x1xf32>
      %53 = math.powf %51, %52 : vector<16x1xf32>
      %cst_31 = arith.constant 1.000000e+00 : f32
      %54 = vector.broadcast %cst_31 : f32 to vector<16x1xf32>
      %55 = arith.subf %54, %53 : vector<16x1xf32>
      %cst_32 = arith.constant 1.42857146 : f32
      %56 = vector.broadcast %cst_32 : f32 to vector<16x1xf32>
      %57 = arith.mulf %55, %56 : vector<16x1xf32>
      %cst_33 = arith.constant 0.549182534 : f32
      %58 = vector.broadcast %cst_33 : f32 to vector<16x1xf32>
      %59 = arith.subf %57, %58 : vector<16x1xf32>
      %c0_34 = arith.constant 0 : index
      %c0_35 = arith.constant 0 : index
      %60 = vector.load %arg5[%c0_34, %c0_35] : memref<16x1xf32, #tpu.memory_space<vmem>>, vector<16x1xf32>
      %61 = arith.mulf %59, %60 : vector<16x1xf32>
      %c0_36 = arith.constant 0 : index
      %c0_37 = arith.constant 0 : index
      %62 = vector.load %arg6[%c0_36, %c0_37] : memref<16x1xf32, #tpu.memory_space<vmem>>, vector<16x1xf32>
      tpu.vector_store %arg6[%c0_36, %c0_37], %61 {strides = array<i32>} : memref<16x1xf32, #tpu.memory_space<vmem>>, vector<16x1xf32>,
    } else {
    }
    return
  }
  func.func @transform_0(%arg0: i32, %arg1: i32) -> (i32, i32) {
    %c0_i32 = arith.constant 0 : i32
    %c0_i32_0 = arith.constant 0 : i32
    return %arg0, %c0_i32 : i32, i32
  }
  func.func @transform_1(%arg0: i32, %arg1: i32) -> (i32, i32) {
    %c0_i32 = arith.constant 0 : i32
    %c0_i32_0 = arith.constant 0 : i32
    return %arg1, %c0_i32 : i32, i32
  }
  func.func @transform_2(%arg0: i32, %arg1: i32) -> (i32, i32) {
    %c0_i32 = arith.constant 0 : i32
    %c0_i32_0 = arith.constant 0 : i32
    return %arg0, %c0_i32 : i32, i32
  }
  func.func @transform_3(%arg0: i32, %arg1: i32) -> (i32, i32) {
    %c0_i32 = arith.constant 0 : i32
    %c0_i32_0 = arith.constant 0 : i32
    return %arg0, %c0_i32 : i32, i32
  }
  func.func @transform_4(%arg0: i32, %arg1: i32) -> (i32, i32) {
    %c0_i32 = arith.constant 0 : i32
    %c0_i32_0 = arith.constant 0 : i32
    return %arg0, %c0_i32 : i32, i32
  }
}

</mosaic_0001>

<bundles_post_ra>
// kernel: tpu_custom_call.1
= control target key start
LH: loop header
LB: loop body
LE: loop exit
PB: predicated region body
PF: predicated region fallthrough
CT: control target
= control target key end

     0   :  { %9 = vsyncpa [#allocation6], 0  ;;  %s1247_s0 = inlined_call_operand.vmem [shape: bf16[48,128], index: 0, kind: input, shape index: {}]   ;;  %s1248_s1 = inlined_call_operand.hbm [shape: bf16[256,128], index: 1, kind: input, shape index: {}]   ;;  %s1249_s2 = inlined_call_operand.vmem [shape: s32[48,1], index: 2, kind: input, shape index: {}]   ;;  %s1250_s3 = inlined_call_operand.vmem [shape: f32[48,1], index: 3, kind: input, shape index: {}]   ;;  %s1251_s4 = inlined_call_operand.vmem [shape: f32[48,1], index: 4, kind: output, shape index: {}]  }
   0x1   :  { %11 = vsyncpa [#allocation6 + $0x1], 0  ;;  %s1055_s15 = smov 0   ;;  %s1057_s16 = smov 0  }
   0x2   :  { %s1059_s17 = smov 0   ;;  %s1061_s18 = smov 0  }
   0x3   :  { %s1063_s19 = smov 0   ;;  %s1065_s20 = smov 0  }
   0x4   :  { %s1067_s21 = smov 0   ;;  %s1069_s22 = smov 0  }
   0x5 LB: > { %s620_s23 = sadd.s32 4294967295, %s1023_s22   ;;  %s26_s24 = sadd.s32 1, %s1015_s20  ;;  %s1023_s22 = sphi %s1069_s22, %s17_s22   ;;  %s1019_s21 = sphi %s1067_s21, %s1260_s21   ;;  %s1015_s20 = sphi %s1065_s20, %s1259_s20   ;;  %s1011_s19 = sphi %s1063_s19, %s1258_s19   ;;  %s1007_s18 = sphi %s1061_s18, %s1257_s18   ;;  %s1003_s17 = sphi %s1059_s17, %s1256_s17   ;;  %s999_s16 = sphi %s1057_s16, %s1255_s16   ;;  %s995_s15 = sphi %s1055_s15, %s1254_s15  }
   0x6   : > { %p27_p0 = scmp.ge.s32.totalorder %s26_s24, 2  ;;  %s29_s25 = sadd.s32 1, %s1019_s21 }
   0x7   : > { %s62_s26 = sadd.s32 1, %s1003_s17  ;;  %p69_p1 = scmp.ne.s32.totalorder %s1003_s17, %s999_s16 }
   0x8   : > { %s1262_s24 = smov (%p27_p0, %s26_s24), 0  ;;  %s1264_s25 = smov (!%p27_p0, %s29_s25), %s1019_s21 }
   0x9   : > { %s59_s27 = ssub.s32 %s1015_s20, %s1262_s24  ;;  %p70_p2 = scmp.eq.s32.totalorder %s1023_s22, 0 }
   0xa   : > { %p31_p3 = scmp.ge.s32.totalorder %s1264_s25, 3  ;;  %p60_p4 = scmp.eq.s32.totalorder %s59_s27, 0 }
   0xb   : > { %p1105_p5 = por %p70_p2, %p69_p1  ;;  %p75_p6 = scmp.ne.s32.totalorder %s999_s16, %s995_s15 }
   0xc   : > { %s1266_s25 = smov (%p31_p3, %s1264_s25), 0  ;;  %p76_p7 = scmp.eq.s32.totalorder %s620_s23, 0 }
   0xd   : > { %s1113_s29 = scalar_select %p60_p4, %s1003_s17, %s62_s26  }
   0xe   : > { %p838_p8 = scmp.lt.s32.totalorder %s1023_s22, 6  ;;  %s186_s30 = sand.u32 1, %s1003_s17  }
   0xf   : > { %p1117_p9 = por %p76_p7, %p75_p6  ;;  %s624_s6 = sshll.u32 %s186_s30, 6 }
  0x10   : > { %s680_s7 = sshll.u32 %s1015_s20, 6  ;;  %s190_s12 = scalar_lea.vmem [#allocation5], %s624_s6 }
  0x11   : > { %s195_s10 = scalar_lea.hbm %s1248_s1, %s680_s7  ;;  %s198_s13 = sshll.u32 %s190_s12, 4  ;;  %s199_s13 = int_to_ptr.vmem [resolvable:$true] %s198_s13 }
  0x12   : > { %s196_s11 = sshll.u32 %s195_s10, 4  ;;  %p835_p10 = pnand %p838_p8, %p1105_p5  ;;  %s197_s11 = int_to_ptr.hbm [resolvable:$true] %s196_s11 }
  0x13   : > { %p627_p11 = scmp.ge.s32.totalorder %s1023_s22, 1  ;;  %p224_p12 = scmp.lt.s32.totalorder %s1023_s22, 7 }
  0x14   : > { %s187_s14 = scalar_lea.sflag [#allocation6], %s186_s30  ;;  %s1025_s15 = smov 64  }
  0x15   : > { %s1026_s23 = smov 4   ;;  %p225_p13 = pnand %p627_p11, %p224_p12 }
  0x16   : > { %837 = dma.hbm_to_vmem [thread:$0]  (!%p835_p10), %s197_s11, 1024, %s199_s13, %s187_s14, %s1025_s15, %s1025_s15, %s1026_s23  }
  0x17   : > { %228 = sbr.rel (%p225_p13) target bundleno = 689 (0x2b1), region = 36  ;;  %s230_s26 = sand.u32 (!%p225_p13), 1, %s999_s16  }
  0x18   : > { %s628_s27 = sshll.u32 (!%p225_p13), %s230_s26, 6  ;;  %s231_s7 = scalar_lea.sflag (!%p225_p13), [#allocation6], %s230_s26 }
  0x19   : > { %s1130_s8 = scalar_lea.vmem (!%p225_p13), [#allocation5], %s628_s27 }
  0x1c   : > { %990 = dma.done.wait (%p1117_p9), %s231_s7, 1024  }
  0x1d   : > { %992 = vsyncadd (%p1117_p9), %s231_s7, 4294966272  ;;  %s629_s28 = sshll.u32 %s1011_s19, 1  ;;  %p637_p1 = scmp.ne.s32.totalorder %s1007_s18, 0 }
  0x1e   : > { %p276_p0 = scmp.lt.s32.totalorder %s629_s28, 5 }
  0x1f   : > { %303 = sbr.rel (%p637_p1) target bundleno = 43 (0x2b), region = 44 }
  0x20   : > { %s1268_s28 = smov (!%p276_p0, %s629_s28), 5 }
  0x21   : > { %s630_s30 = sshll.u32 %s1268_s28, 2  ;;  %s632_s6 = sshll.u32 %s1268_s28, 3 }
  0x22   : > { %s1140_s11 = scalar_lea.vmem %s1247_s0, %s630_s30  ;;  %s1145_s14 = scalar_lea.vmem %s1249_s2, %s632_s6 }
  0x23   : > { %s1150_s5 = scalar_lea.vmem %s1250_s3, %s632_s6  ;;  %s1155_s27 = scalar_lea.vmem %s1251_s4, %s632_s6 }
  0x24   : > { %vm304_vm0 = vcmask 7168   ;;  %v1027_v0 = vmov -inf   ;;  %v1028_v1 = vmov 0.0  }
  0x25   : > { %305 = vst.msk [vmem:[#allocation2] sm:$0xff] %vm304_vm0, %v1027_v0 }
  0x26   : > { %306 = vst.msk [vmem:[#allocation2 + $0x8] sm:$0xff] %vm304_vm0, %v1027_v0 }
  0x27   : > { %307 = vst.msk [vmem:[#allocation3] sm:$0xff] %vm304_vm0, %v1028_v1 }
  0x28   : > { %308 = vst.msk [vmem:[#allocation3 + $0x8] sm:$0xff] %vm304_vm0, %v1028_v1 }
  0x29   : > { %309 = vst.msk [vmem:[#allocation4] sm:$0xff] %vm304_vm0, %v1028_v1 }
  0x2a   : > { %310 = vst.msk [vmem:[#allocation4 + $0x8] sm:$0xff] %vm304_vm0, %v1028_v1 }
  0x2b PF: > { %v689_v2 = vld [vmem:[%s1130_s8 + $0x38] sm:$0xff]  ;;  %v688_v3 = vld [vmem:[%s1130_s8 + $0x30] sm:$0xff]  ;;  %v687_v4 = vld [vmem:[%s1130_s8 + $0x28] sm:$0xff]  ;;  %s674_s7 = sshll.u32 %s1007_s18, 7  ;;  %v399_v11 = vlaneseq  ;;  %v1029_v20 = vmov 0   ;;  %vm452_vm2 = vcmask 7168  }
  0x2c   : > { %383 = vmatpush.bf16.xpose.msra.mxu0 %v689_v2  ;;  %v686_v5 = vld [vmem:[%s1130_s8 + $0x20] sm:$0xff]  ;;  %v685_v6 = vld [vmem:[%s1130_s8 + $0x18] sm:$0xff]  ;;  %v684_v7 = vld [vmem:[%s1130_s8 + $0x10] sm:$0xff]  ;;  %s402_s28 = ssub.s32 200, %s674_s7  ;;  %908 = vset.pattern.permute.xlu1 %v1029_v20  ;;  %v439_v22 = vstv %s674_s7  ;;  %p675_p2 = scmp.ne.s32.totalorder %s1007_s18, 1 }
  0x2d   : > { %v683_v8 = vld [vmem:[%s1130_s8 + $0x8] sm:$0xff]  ;;  %v682_v9 = vld [vmem:[%s1130_s8] sm:$0xff]  ;;  %v681_v10 = vld [vmem:[%s1140_s11] sm:$0xff]  ;;  %v400_v12 = vand.u32 127, %v399_v11  ;;  %v403_v13 = vstv %s402_s28  ;;  %909 = vset.pattern.permute.xlu2 %v1029_v20  ;;  %910 = vset.pattern.permute.xlu0 %v1029_v20 }
  0x2e   : > { %v437_v21 = vld [vmem:[%s1145_s14] sm:$0xff]  ;;  %v438_v24 = vld [vmem:[%s1145_s14 + $0x8] sm:$0xff]  ;;  %v442_v49 = vld [vmem:[#allocation3] sm:$0xff] }
  0x2f   : > { %vm404_vm1 = vcmp.lt.s32.totalorder %v400_v12, %v403_v13  ;;  %v440_v23 = vsub.s32 %v437_v21, %v439_v22  ;;  %v441_v25 = vsub.s32 %v438_v24, %v439_v22  ;;  %v407_v26 = vld [vmem:[#allocation2] sm:$0xff]  ;;  %v408_v30 = vld [vmem:[#allocation2 + $0x8] sm:$0xff]  ;;  %v443_v58 = vld [vmem:[#allocation3 + $0x8] sm:$0xff] }
  0x30   : > { %v455_v50 = vld [vmem:[#allocation4] sm:$0xff] }
  0x31   : > { %460 = vperm.xlu2 %909, %v440_v23   ;;  %v456_v59 = vld [vmem:[#allocation4 + $0x8] sm:$0xff] }
  0x34   : > { %384 = vmatpush.bf16.xpose.msra.mxu0 %v688_v3 }
  0x39   : > { %463 = vperm.xlu2 %909, %v441_v25  }
  0x3c   : > { %385 = vmatpush.bf16.xpose.msra.mxu0 %v687_v4 }
  0x44   : > { %386 = vmatpush.bf16.xpose.msra.mxu0 %v686_v5 }
  0x4c   : > { %387 = vmatpush.bf16.xpose.msra.mxu0 %v685_v6 }
  0x54   : > { %388 = vmatpush.bf16.xpose.msra.mxu0 %v684_v7 }
  0x5c   : > { %389 = vmatpush.bf16.xpose.msra.mxu0 %v683_v8 }
  0x64   : > { %390 = vmatpush.bf16.xpose.msra.mxu0 %v682_v9 }
  0x6b   : > { %391 = vmatmul.bf16.vlgmr.msra.gmra.mxu0 %v681_v10 }
  0x8b   : > { %v461_v37 = vpop.permute.xlu2 %460 }
  0x8c   : > { %vm465_vm3 = vcmp.eq.s32.totalorder %v400_v12, %v461_v37 }
  0x93   : > { %v464_v43 = vpop.permute.xlu2 %463 }
  0x94   : > { %vm466_vm4 = vcmp.eq.s32.totalorder %v400_v12, %v464_v43 }
  0xe8   : > { %v392_v14 = vpop.f32.mrf.mxu0 }
  0xe9   : > { %v397_v15 = vmul.f32 20.0, %v392_v14 }
  0xeb   : > { %v405_v16 = vsel %vm404_vm1, %v397_v15, -1e+30 }
  0xec   : > { %409 = vmax.xlane.f32.xlu0 %v405_v16 }
  0xf0   : > { %v394_v17 = vpop.f32.mrf.mxu0 }
  0xf1   : > { %v398_v18 = vmul.f32 20.0, %v394_v17 }
  0xf3   : > { %v406_v19 = vsel %vm404_vm1, %v398_v18, -1e+30 }
  0xf4   : > { %411 = vmax.xlane.f32.xlu0 %v406_v19 }
 0x15f   : > { %v410_v27 = vpop.xlane.xlu0 %409 }
 0x160   : > { %v413_v28 = vmax.f32 %v407_v26, %v410_v27 }
 0x162   : > { %v415_v29 = vsub.f32 %v407_v26, %v413_v28  ;;  %477 = vst.msk [vmem:[#allocation2] sm:$0xff] %vm452_vm2, %v413_v28  ;;  %423 = vperm.xlu1 %908, %v413_v28  }
 0x164   : > { %v417_v46 = vmul.f32 1.442695, %v415_v29 }
 0x167   : > { %v412_v31 = vpop.xlane.xlu0 %411 }
 0x168   : > { %v414_v32 = vmax.f32 %v408_v30, %v412_v31 }
 0x16a   : > { %v416_v33 = vsub.f32 %v408_v30, %v414_v32  ;;  %478 = vst.msk [vmem:[#allocation2 + $0x8] sm:$0xff] %vm452_vm2, %v414_v32  ;;  %428 = vperm.xlu1 %908, %v414_v32  }
 0x16c   : > { %v419_v47 = vmul.f32 1.442695, %v416_v33 }
 0x1d4   : > { %v424_v34 = vpop.permute.xlu1 %423 }
 0x1d5   : > { %v431_v35 = vsub.f32 %v405_v16, %v424_v34 }
 0x1d7   : > { %v433_v36 = vmul.f32 1.442695, %v431_v35 }
 0x1d9   : > { %911 = vpow2.f32 %v433_v36 }
 0x1dc   : > { %v429_v38 = vpop.permute.xlu1 %428 }
 0x1dd   : > { %v432_v39 = vsub.f32 %v406_v19, %v429_v38 }
 0x1df   : > { %v912_v40 = vpop.eup %911  ;;  %v435_v41 = vmul.f32 1.442695, %v432_v39 }
 0x1e0   : > { %446 = vadd.xlane.f32.xlu0 %v912_v40  ;;  %v467_v42 = vsel %vm465_vm3, %v912_v40, 0.0 }
 0x1e1   : > { %913 = vpow2.f32 %v435_v41  ;;  %469 = vadd.xlane.f32.xlu2 %v467_v42 }
 0x1e2   : > { %915 = vpow2.f32 %v417_v46 }
 0x1e3   : > { %917 = vpow2.f32 %v419_v47 }
 0x1e7   : > { %v914_v44 = vpop.eup %913 }
 0x1e8   : > { %448 = vadd.xlane.f32.xlu1 %v914_v44  ;;  %v468_v45 = vsel %vm466_vm4, %v914_v44, 0.0  ;;  %v916_v48 = vpop.eup %915 }
 0x1e9   : > { %471 = vadd.xlane.f32.xlu0 %v468_v45  ;;  %v444_v51 = vmul.f32 %v916_v48, %v442_v49  ;;  %v457_v53 = vmul.f32 %v916_v48, %v455_v50  ;;  %v918_v57 = vpop.eup %917 }
 0x1ea   : > { %v445_v60 = vmul.f32 %v918_v57, %v443_v58  ;;  %v458_v62 = vmul.f32 %v918_v57, %v456_v59 }
 0x253   : > { %v447_v52 = vpop.xlane.xlu0 %446 }
 0x254   : > { %v450_v54 = vadd.f32 %v447_v52, %v444_v51  ;;  %v470_v55 = vpop.xlane.xlu2 %469 }
 0x255   : > { %v473_v56 = vadd.f32 %v470_v55, %v457_v53 }
 0x256   : > { %453 = vst.msk [vmem:[#allocation3] sm:$0xff] %vm452_vm2, %v450_v54 }
 0x257   : > { %475 = vst.msk [vmem:[#allocation4] sm:$0xff] %vm452_vm2, %v473_v56 }
 0x25b   : > { %v449_v61 = vpop.xlane.xlu1 %448  ;;  %482 = sbr.rel (%p675_p2) target bundleno = 689 (0x2b1), region = 48 }
 0x25c   : > { %v451_v63 = vadd.f32 %v449_v61, %v445_v60  ;;  %v472_v0 = vpop.xlane.xlu0 %471 }
 0x25d   : > { %v474_v1 = vadd.f32 %v472_v0, %v458_v62 }
 0x25e   : > { %454 = vst.msk [vmem:[#allocation3 + $0x8] sm:$0xff] %vm452_vm2, %v451_v63 }
 0x25f   : > { %476 = vst.msk [vmem:[#allocation4 + $0x8] sm:$0xff] %vm452_vm2, %v474_v1 }
 0x260   : > { %v485_v2 = vld [vmem:[#allocation3] sm:$0xff]  ;;  %v483_v4 = vld [vmem:[#allocation4] sm:$0xff] }
 0x261   : > { %919 = vrcp.f32 %v485_v2 }
 0x265   : > { %v486_v3 = vld [vmem:[#allocation3 + $0x8] sm:$0xff] }
 0x266   : > { %921 = vrcp.f32 %v486_v3  ;;  %v484_v5 = vld [vmem:[#allocation4 + $0x8] sm:$0xff] }
 0x267   : > { %v920_v6 = vpop.eup %919 }
 0x268   : > { %v1177_v8 = vmul.f32 %v920_v6, %v483_v4 }
 0x26a   : > { %v1182_v10 = vand.u32 2147483647, %v1177_v8  ;;  %vm741_vm15 = vcmp.lt.f32.partialorder %v1177_v8, 0  ;;  %vm742_vm0 = vcmp.eq.f32.partialorder %v1177_v8, 0  ;;  %vm754_vm4 = vcmp.ne.f32.partialorder %v1177_v8, %v1177_v8 }
 0x26c   : > { %v922_v7 = vpop.eup %921  ;;  %v700_v12 = vand.u32 8388607, %v1182_v10  ;;  %v696_v24 = vand.u32 2139095040, %v1182_v10  ;;  %vm734_vm7 = vweird.f32 %v1182_v10  ;;  %vm733_vm8 = vcmp.lt.f32.partialorder %v1182_v10, 0.0 }
 0x26d   : > { %v1179_v9 = vmul.f32 %v922_v7, %v484_v5  ;;  %vm732_vm9 = vcmp.eq.f32.partialorder %v1182_v10, 0.0  ;;  %vm731_vm11 = vcmp.eq.f32.partialorder %v1182_v10, 1.0  ;;  %vm746_vm1 = vcmp.eq.f32.partialorder %v1182_v10, 2139095040 }
 0x26e   : > { %v701_v14 = vor.u32 8388608, %v700_v12  ;;  %v697_v32 = vshrl.u32 %v696_v24, 23 }
 0x26f   : > { %v1185_v11 = vand.u32 2147483647, %v1179_v9  ;;  %vm812_vm3 = vcmp.lt.f32.partialorder %v1179_v9, 0 }
 0x270   : > { %v703_v15 = vand.u32 8388607, %v701_v14  ;;  %v759_v41 = vadd.s32 4294967169, %v697_v32 }
 0x271   : > { %v771_v13 = vand.u32 8388607, %v1185_v11  ;;  %v767_v28 = vand.u32 2139095040, %v1185_v11  ;;  %vm805_vm10 = vweird.f32 %v1185_v11  ;;  %vm804_vm12 = vcmp.lt.f32.partialorder %v1185_v11, 0.0 }
 0x272   : > { %v704_v17 = vor.u32 1065353216, %v703_v15  ;;  %v708_v51 = vadd.s32 1, %v759_v41  ;;  %vm803_vm13 = vcmp.eq.f32.partialorder %v1185_v11, 0.0  ;;  %vm802_vm14 = vcmp.eq.f32.partialorder %v1185_v11, 1.0 }
 0x273   : > { %v772_v16 = vor.u32 8388608, %v771_v13  ;;  %v768_v36 = vshrl.u32 %v767_v28, 23 }
 0x274   : > { %vm705_vm5 = vcmp.ge.f32.partialorder %v704_v17, 1.4142135  ;;  %v706_v19 = vmul.f32 0.5, %v704_v17 }
 0x275   : > { %v774_v18 = vand.u32 8388607, %v772_v16  ;;  %v830_v46 = vadd.s32 4294967169, %v768_v36  ;;  %v709_v61 = vsel %vm705_vm5, %v708_v51, %v759_v41  ;;  %v500_v41 = vld [vmem:[%s1150_s5 + $0x8] sm:$0xff] }
 0x276   : > { %v707_v21 = vsel %vm705_vm5, %v706_v19, %v704_v17  ;;  %v729_v4 = vcvt.s32.f32 %v709_v61  ;;  %vm813_vm5 = vcmp.eq.f32.partialorder %v1179_v9, 0 }
 0x277   : > { %v775_v20 = vor.u32 1065353216, %v774_v18  ;;  %v760_v23 = vadd.f32 -1.0, %v707_v21  ;;  %v779_v56 = vadd.s32 1, %v830_v46 }
 0x279   : > { %vm776_vm6 = vcmp.ge.f32.partialorder %v775_v20, 1.4142135  ;;  %v777_v22 = vmul.f32 0.5, %v775_v20  ;;  %v711_v26 = vmul.f32 %v760_v23, %v760_v23 }
 0x27a   : > { %v780_v1 = vsel %vm776_vm6, %v779_v56, %v830_v46 }
 0x27b   : > { %v778_v25 = vsel %vm776_vm6, %v777_v22, %v775_v20  ;;  %v712_v29 = vmul.f32 0.12621109, %v711_v26  ;;  %v714_v30 = vmul.f32 -0.20706727, %v711_v26  ;;  %v800_v12 = vcvt.s32.f32 %v780_v1 }
 0x27c   : > { %v831_v27 = vadd.f32 -1.0, %v778_v25  ;;  %vm743_vm6 = vcmp.eq.f32.partialorder %v1177_v8, 1065353216 }
 0x27d   : > { %v713_v33 = vadd.f32 0.21545328, %v712_v29  ;;  %v715_v34 = vadd.f32 -0.23896284, %v714_v30 }
 0x27e   : > { %v782_v31 = vmul.f32 %v831_v27, %v831_v27 }
 0x27f   : > { %v716_v38 = vmul.f32 %v713_v33, %v711_v26  ;;  %v718_v39 = vmul.f32 %v715_v34, %v711_v26 }
 0x280   : > { %v783_v35 = vmul.f32 0.12621109, %v782_v31  ;;  %v785_v37 = vmul.f32 -0.20706727, %v782_v31 }
 0x281   : > { %v717_v43 = vadd.f32 0.28795174, %v716_v38  ;;  %v719_v44 = vadd.f32 -0.3607037, %v718_v39 }
 0x282   : > { %v784_v40 = vadd.f32 0.21545328, %v783_v35  ;;  %v786_v42 = vadd.f32 -0.23896284, %v785_v37 }
 0x283   : > { %v720_v48 = vmul.f32 %v717_v43, %v711_v26  ;;  %v722_v49 = vmul.f32 %v719_v44, %v711_v26 }
 0x284   : > { %v787_v45 = vmul.f32 %v784_v40, %v782_v31  ;;  %v789_v47 = vmul.f32 %v786_v42, %v782_v31 }
 0x285   : > { %v721_v53 = vadd.f32 0.48090908, %v720_v48  ;;  %v723_v54 = vadd.f32 -0.72134733, %v722_v49 }
 0x286   : > { %v788_v50 = vadd.f32 0.28795174, %v787_v45  ;;  %v790_v52 = vadd.f32 -0.3607037, %v789_v47 }
 0x287   : > { %v724_v58 = vmul.f32 %v721_v53, %v711_v26  ;;  %v726_v59 = vmul.f32 %v760_v23, %v723_v54 }
 0x288   : > { %v791_v55 = vmul.f32 %v788_v50, %v782_v31  ;;  %v793_v57 = vmul.f32 %v790_v52, %v782_v31 }
 0x289   : > { %v725_v63 = vadd.f32 1.442695, %v724_v58 }
 0x28a   : > { %v792_v60 = vadd.f32 0.48090908, %v791_v55  ;;  %v794_v62 = vadd.f32 -0.72134733, %v793_v57 }
 0x28b   : > { %v727_v3 = vadd.f32 %v726_v59, %v725_v63 }
 0x28c   : > { %v795_v0 = vmul.f32 %v792_v60, %v782_v31  ;;  %v797_v2 = vmul.f32 %v831_v27, %v794_v62 }
 0x28d   : > { %v728_v6 = vmul.f32 %v760_v23, %v727_v3 }
 0x28e   : > { %v796_v5 = vadd.f32 1.442695, %v795_v0 }
 0x28f   : > { %v730_v13 = vadd.f32 %v729_v4, %v728_v6 }
 0x290   : > { %v798_v7 = vadd.f32 %v797_v2, %v796_v5 }
 0x291   : > { %v735_v15 = vsel %vm734_vm7, %v1182_v10, %v730_v13  ;;  %vm817_vm7 = vcmp.eq.f32.partialorder %v1185_v11, 2139095040 }
 0x292   : > { %v799_v14 = vmul.f32 %v831_v27, %v798_v7  ;;  %v736_v17 = vsel %vm733_vm8, nan, %v735_v15  ;;  %vm825_vm8 = vcmp.ne.f32.partialorder %v1179_v9, %v1179_v9 }
 0x293   : > { %v737_v18 = vsel %vm732_vm9, -inf, %v736_v17  ;;  %vm814_vm9 = vcmp.eq.f32.partialorder %v1179_v9, 1065353216 }
 0x294   : > { %v801_v16 = vadd.f32 %v800_v12, %v799_v14  ;;  %v738_v20 = vsel %vm731_vm11, 0.0, %v737_v18 }
 0x295   : > { %v739_v22 = vmul.f32 0.7, %v738_v20 }
 0x296   : > { %v806_v19 = vsel %vm805_vm10, %v1185_v11, %v801_v16  ;;  %v499_v11 = vld [vmem:[%s1150_s5] sm:$0xff] }
 0x297   : > { %v807_v21 = vsel %vm804_vm12, nan, %v806_v19  ;;  %923 = vpow2.f32 %v739_v22 }
 0x298   : > { %v808_v23 = vsel %vm803_vm13, -inf, %v807_v21 }
 0x299   : > { %v809_v24 = vsel %vm802_vm14, 0.0, %v808_v23 }
 0x29a   : > { %v810_v25 = vmul.f32 0.7, %v809_v24 }
 0x29c   : > { %925 = vpow2.f32 %v810_v25 }
 0x29d   : > { %v924_v26 = vpop.eup %923 }
 0x29e   : > { %v747_v27 = vsel %vm741_vm15, 2143289344, %v924_v26 }
 0x29f   : > { %v748_v29 = vsel %vm742_vm0, 0, %v747_v27 }
 0x2a0   : > { %v753_v30 = vsel %vm746_vm1, 2139095040, %v748_v29 }
 0x2a1   : > { %v757_v10 = vsel %vm754_vm4, 2143289344, %v753_v30 }
 0x2a2   : > { %v926_v28 = vpop.eup %925  ;;  %v758_v33 = vsel %vm743_vm6, 1065353216, %v757_v10 }
 0x2a3   : > { %v818_v31 = vsel %vm812_vm3, 2143289344, %v926_v28  ;;  %v493_v35 = vsub.f32 1.0, %v758_v33 }
 0x2a4   : > { %v819_v32 = vsel %vm813_vm5, 0, %v818_v31 }
 0x2a5   : > { %v824_v34 = vsel %vm817_vm7, 2139095040, %v819_v32  ;;  %v495_v37 = vmul.f32 1.4285715, %v493_v35 }
 0x2a6   : > { %v828_v8 = vsel %vm825_vm8, 2143289344, %v824_v34 }
 0x2a7   : > { %v829_v36 = vsel %vm814_vm9, 1065353216, %v828_v8  ;;  %v676_v39 = vadd.f32 -0.54918253, %v495_v37 }
 0x2a8   : > { %v494_v38 = vsub.f32 1.0, %v829_v36 }
 0x2a9   : > { %v501_v42 = vmul.f32 %v676_v39, %v499_v11 }
 0x2aa   : > { %v496_v40 = vmul.f32 1.4285715, %v494_v38 }
 0x2ab   : > { %503 = vst.msk [vmem:[%s1155_s27] sm:$0xff] %vm452_vm2, %v501_v42 }
 0x2ac   : > { %v677_v43 = vadd.f32 -0.54918253, %v496_v40 }
 0x2ae   : > { %v502_v44 = vmul.f32 %v677_v43, %v500_v41 }
 0x2b0   : > { %504 = vst.msk [vmem:[%s1155_s27 + $0x8] sm:$0xff] %vm452_vm2, %v502_v44 }
 0x2b1 PF: > { %s17_s22 = sadd.s32 1, %s1023_s22   ;;  %s1254_s15 = smov %s999_s16 }
 0x2b2   : > { %p14_p3 = scmp.ge.s32.totalorder %s17_s22, 8   ;;  %s1255_s16 = smov %s1003_s17 }
 0x2b3   : > { %s1256_s17 = smov %s1113_s29  ;;  %s1257_s18 = smov %s1015_s20 }
 0x2b4   : > { %s1258_s19 = smov %s1019_s21  ;;  %s1259_s20 = smov %s1262_s24 }
 0x2b5   : > { %s1260_s21 = smov %s1266_s25  ;;  %16 = sbr.rel (!%p14_p3) target bundleno = 5 (0x5), region = 93 }
 0x2ba   :  { %527 = vsyncpa [#allocation6], 1 }
 0x2bb   :  { %529 = vsyncpa [#allocation6 + $0x1], 1 }

</bundles_post_ra>
